<compile_context>
chip_gen: v7x
topology: tpu7x:2x2x1
jax: 0.10.0
libtpu: 0.0.40
codegen_flags: <defaults>
</compile_context>

<pallas_src>
import math

import jax
import jax.numpy as jnp
from jax.experimental import pallas as pl
from jax.experimental.pallas import tpu as pltpu

_EPS = 1e-5
_MIB = 1024 * 1024


def _round_up(x, m):
    return (x + m - 1) // m * m


# ---------------------------------------------------------------------------
# Generation-aware VMEM budgets.
# ---------------------------------------------------------------------------
def _detect_vmem_capacity():
    try:
        info = pltpu.get_tpu_info()
        for attr in ("vmem_capacity_bytes", "vmem_size_bytes", "vmem_bytes"):
            cap = getattr(info, attr, None)
            if cap:
                return int(cap)
    except Exception:
        pass
    return 64 * _MIB  # conservative fallback (v7x per-TensorCore)


_VMEM_CAP = _detect_vmem_capacity()

if _VMEM_CAP >= 96 * _MIB:
    # v5e / v6e class (128 MiB physical VMEM): plenty of room.
    _VMEM_LIMIT_BYTES = 64 * _MIB
    _PIPELINE_BYTES_BUDGET = 48 * _MIB
else:
    # v7x class (64 MiB physical): still want BIG tiles (3.2 TB/s HBM makes
    # per-step overhead dominate small blocks), but leave headroom for Mosaic
    # internal scratch.
    _VMEM_LIMIT_BYTES = 48 * _MIB
    _PIPELINE_BYTES_BUDGET = 34 * _MIB


def _elem_budget(itemsize):
    # Per-element VMEM cost of one block: in + out, each double-buffered
    # (4 * itemsize), plus ~2 blocks of f32 temps inside the kernel (upcast x
    # and the centered copy): +8 bytes.
    return max(1, _PIPELINE_BYTES_BUDGET // (4 * itemsize + 8))


def _per_call_vmem_limit(block_elems, itemsize):
    # If the minimum legal tile overshoots the default limit (e.g. huge C with
    # the 128-lane minimum), raise the limit instead of failing; clamp below
    # physical capacity so Mosaic keeps scratch headroom.
    est = block_elems * (4 * itemsize + 8)
    return int(min(_VMEM_CAP - 8 * _MIB,
                   max(_VMEM_LIMIT_BYTES, est + 8 * _MIB)))


# ---------------------------------------------------------------------------
# Channels-on-sublanes kernel: reduce over C (axis 1), N on lanes.
# ---------------------------------------------------------------------------
def _ln_channels_kernel(x_ref, w_ref, b_ref, o_ref):
    # x_ref: (TB, C, TN)   w_ref / b_ref: (1, C, 1) f32   o_ref: (TB, C, TN)
    x = x_ref[...].astype(jnp.float32)
    inv_c = 1.0 / x.shape[1]
    # Two-pass statistics (mean, then centered variance): the extra VPU ops
    # are free under the HBM bottleneck and avoid E[x^2]-E[x]^2 cancellation.
    mu = jnp.sum(x, axis=1, keepdims=True) * inv_c          # (TB, 1, TN)
    xc = x - mu
    var = jnp.sum(xc * xc, axis=1, keepdims=True) * inv_c   # population var
    inv = jax.lax.rsqrt(var + _EPS)                          # EUP slot
    o_ref[...] = (xc * inv * w_ref[...] + b_ref[...]).astype(o_ref.dtype)
    # NOTE: for partial last blocks the out-of-bounds lanes / batch rows carry
    # garbage statistics (possibly inf/NaN through rsqrt), but their stores
    # are masked, so the written output is correct.  Do not "fix" by writing
    # the full padded block.


def _choose_channel_tiles(B, C, N, itemsize):
    budget = _elem_budget(itemsize)
    per_batch = C * N
    if per_batch >= budget:
        # One batch element per block; tile the lane (N) axis.
        tb = 1
        tn = max(128, (budget // C) // 128 * 128)
        if tn >= N:
            tn = N
    else:
        # Small feature maps: fold several batch elements into one block so
        # each grid step still moves multi-MiB.
        tn = N
        tb = min(B, max(1, budget // per_batch))
        if B >= 2:
            # Keep at least two grid steps along batch so both TensorCores
            # (v7x megacore) get work.
            tb = min(tb, -(-B // 2))
    return int(tb), int(tn)


def _layernorm_channels(x3, weight, bias):
    """LayerNorm over axis 1 of a (B, C, N) tensor."""
    B, C, N = x3.shape
    itemsize = x3.dtype.itemsize
    tb, tn = _choose_channel_tiles(B, C, N, itemsize)
    vmem_limit = _per_call_vmem_limit(tb * C * tn, itemsize)

    w3 = weight.reshape(1, C, 1).astype(jnp.float32)
    b3 = bias.reshape(1, C, 1).astype(jnp.float32)

    cost = pl.CostEstimate(
        flops=int(9 * B * C * N),
        transcendentals=int(B * N),
        bytes_accessed=int(2 * B * C * N * itemsize + 8 * C),
    )

    return pl.pallas_call(
        _ln_channels_kernel,
        out_shape=jax.ShapeDtypeStruct((B, C, N), x3.dtype),
        grid=(pl.cdiv(B, tb), pl.cdiv(N, tn)),
        in_specs=[
            pl.BlockSpec((tb, C, tn), lambda i, j: (i, 0, j)),
            pl.BlockSpec((1, C, 1), lambda i, j: (0, 0, 0)),
            pl.BlockSpec((1, C, 1), lambda i, j: (0, 0, 0)),
        ],
        out_specs=pl.BlockSpec((tb, C, tn), lambda i, j: (i, 0, j)),
        compiler_params=pltpu.CompilerParams(
            dimension_semantics=("parallel", "parallel"),
            vmem_limit_bytes=vmem_limit,
        ),
        cost_estimate=cost,
    )(x3, w3, b3)


@jax.jit
def with_bias_layernorm_nchw(x, weight, bias):
    """LayerNorm over the channel dim of an NCHW tensor
    (== DREUDC's to_3d -> WithBias_LayerNorm -> to_4d), no transposes."""
    B, C, H, W = x.shape
    x3 = x.reshape(B, C, H * W)      # contiguous reshape: free under jit
    y3 = _layernorm_channels(x3, weight, bias)
    return y3.reshape(B, C, H, W)


# ---------------------------------------------------------------------------
# Literal module forward: normalize the last dim of (..., C).
# ---------------------------------------------------------------------------
def _ln_lastdim_kernel(x_ref, w_ref, b_ref, o_ref):
    # x_ref: (TM, C)   w_ref / b_ref: (1, C) f32   o_ref: (TM, C)
    x = x_ref[...].astype(jnp.float32)
    inv_c = 1.0 / x.shape[-1]
    mu = jnp.sum(x, axis=-1, keepdims=True) * inv_c
    xc = x - mu
    var = jnp.sum(xc * xc, axis=-1, keepdims=True) * inv_c
    inv = jax.lax.rsqrt(var + _EPS)
    o_ref[...] = (xc * inv * w_ref[...] + b_ref[...]).astype(o_ref.dtype)
    # Partial last blocks: OOB rows get garbage stats but masked stores.


def _choose_row_tile(rows, c, itemsize):
    # Sublane-pack-aligned row tile: 8 for f32, 16 for bf16, 32 for int8/fp8.
    align = max(8, 32 // itemsize)
    budget = _elem_budget(itemsize)
    tm = max(align, (budget // c) // align * align)
    tm = min(tm, _round_up(rows, align))
    return int(tm)


@jax.jit
def with_bias_layernorm_lastdim(x, weight, bias):
    """WithBias_LayerNorm.forward as written: normalize last dim of (..., C)."""
    shape = x.shape
    C = shape[-1]
    rows = math.prod(shape[:-1]) if len(shape) > 1 else 1
    x2 = x.reshape(rows, C)
    itemsize = x.dtype.itemsize

    if C % 128 == 0:
        # Lane-dense (TM, C) row tiles.
        tm = _choose_row_tile(rows, C, itemsize)
        vmem_limit = _per_call_vmem_limit(tm * C, itemsize)
        cost = pl.CostEstimate(
            flops=int(9 * rows * C),
            transcendentals=int(rows),
            bytes_accessed=int(2 * rows * C * itemsize + 8 * C),
        )
        y2 = pl.pallas_call(
            _ln_lastdim_kernel,
            out_shape=jax.ShapeDtypeStruct((rows, C), x.dtype),
            grid=(pl.cdiv(rows, tm),),
            in_specs=[
                pl.BlockSpec((tm, C), lambda i: (i, 0)),
                pl.BlockSpec((1, C), lambda i: (0, 0)),
                pl.BlockSpec((1, C), lambda i: (0, 0)),
            ],
            out_specs=pl.BlockSpec((tm, C), lambda i: (i, 0)),
            compiler_params=pltpu.CompilerParams(
                dimension_semantics=("parallel",),
                vmem_limit_bytes=vmem_limit,
            ),
            cost_estimate=cost,
        )(x2,
          weight.reshape(1, C).astype(jnp.float32),
          bias.reshape(1, C).astype(jnp.float32))
    else:
        # Small / unaligned C (e.g. DREUDC dim~48): (TM, C) blocks would be
        # lane-sparse (masked stores, strided DMA).  Layout plumbing: put rows
        # on lanes and C on sublanes and reuse the channel kernel.
        xt = x2.T.reshape(1, C, rows)
        yt = _layernorm_channels(xt, weight, bias)
        y2 = yt.reshape(C, rows).T
    return y2.reshape(shape)


# ---------------------------------------------------------------------------
# Plain-JAX references (PyTorch semantics: unbiased=False, eps=1e-5).
# ---------------------------------------------------------------------------
def _reference_nchw(x, w, b):
    xf = x.astype(jnp.float32)
    mu = jnp.mean(xf, axis=1, keepdims=True)
    var = jnp.mean((xf - mu) ** 2, axis=1, keepdims=True)
    y = (xf - mu) / jnp.sqrt(var + _EPS)
    return (y * w.reshape(1, -1, 1, 1) + b.reshape(1, -1, 1, 1)).astype(x.dtype)


def _reference_lastdim(x, w, b):
    xf = x.astype(jnp.float32)
    mu = jnp.mean(xf, axis=-1, keepdims=True)
    var = jnp.mean((xf - mu) ** 2, axis=-1, keepdims=True)
    return ((xf - mu) / jnp.sqrt(var + _EPS) * w + b).astype(x.dtype)


if __name__ == "__main__":
    key = jax.random.PRNGKey(0)
    kx, kw, kb, k3, k4, kw4, kb4 = jax.random.split(key, 7)

    # --- DREUDC-style NCHW channel LayerNorm ------------------------------
    B, C, H, W = 2, 32, 16, 16
    x = jax.random.normal(kx, (B, C, H, W), dtype=jnp.float32)
    weight = 1.0 + 0.1 * jax.random.normal(kw, (C,), dtype=jnp.float32)
    bias = 0.1 * jax.random.normal(kb, (C,), dtype=jnp.float32)

    y = jax.block_until_ready(with_bias_layernorm_nchw(x, weight, bias))
    ref = _reference_nchw(x, weight, bias)
    assert jnp.allclose(y, ref, atol=5e-5, rtol=5e-5), "NCHW mismatch"

    # --- Literal module forward, unaligned C (routed via channel layout) ---
    x3 = jax.random.normal(k3, (2, 8, C), dtype=jnp.float32)
    y3 = jax.block_until_ready(with_bias_layernorm_lastdim(x3, weight, bias))
    ref3 = _reference_lastdim(x3, weight, bias)
    assert jnp.allclose(y3, ref3, atol=5e-5, rtol=5e-5), "last-dim (C=32) mismatch"

    # --- Literal module forward, lane-aligned C (direct row-tile path) -----
    C4 = 128
    x4 = jax.random.normal(k4, (2, 8, C4), dtype=jnp.float32)
    weight4 = 1.0 + 0.1 * jax.random.normal(kw4, (C4,), dtype=jnp.float32)
    bias4 = 0.1 * jax.random.normal(kb4, (C4,), dtype=jnp.float32)
    y4 = jax.block_until_ready(with_bias_layernorm_lastdim(x4, weight4, bias4))
    ref4 = _reference_lastdim(x4, weight4, bias4)
    assert jnp.allclose(y4, ref4, atol=5e-5, rtol=5e-5), "last-dim (C=128) mismatch"

    print("KERNEL_OK")
</pallas_src>

<mosaic_0001>
module attributes {stable_mosaic.version = 11 : i64} {
  func.func @_ln_channels_kernel(%arg0: i32, %arg1: i32, %arg2: memref<1x32x256xf32, #tpu.memory_space<vmem>>, %arg3: memref<1x32x1xf32, #tpu.memory_space<vmem>>, %arg4: memref<1x32x1xf32, #tpu.memory_space<vmem>>, %arg5: memref<1x32x256xf32, #tpu.memory_space<vmem>>) attributes {dimension_semantics = [#tpu.dimension_semantics<parallel>, #tpu.dimension_semantics<parallel>], iteration_bounds = array<i64: 2, 1>, scalar_prefetch = 0 : i64, scratch_operands = 0 : i64, tpu.core_type = #tpu.core_type<tc>, window_params = [{transform_indices = @transform_0, window_bounds = array<i64: 1, 32, 256>}, {pipeline_mode = #tpu.pipeline_mode<synchronous>, transform_indices = @transform_1, window_bounds = array<i64: 1, 32, 1>}, {pipeline_mode = #tpu.pipeline_mode<synchronous>, transform_indices = @transform_2, window_bounds = array<i64: 1, 32, 1>}, {transform_indices = @transform_3, window_bounds = array<i64: 1, 32, 256>}]} {
    %c0 = arith.constant 0 : index
    %c0_0 = arith.constant 0 : index
    %c0_1 = arith.constant 0 : index
    %0 = vector.load %arg2[%c0, %c0_0, %c0_1] : memref<1x32x256xf32, #tpu.memory_space<vmem>>, vector<1x32x256xf32>
    %cst = arith.constant dense<0.000000e+00> : vector<1x256xf32>
    %1 = vector.multi_reduction <add>, %0, %cst [1] : vector<1x32x256xf32> to vector<1x256xf32>
    %2 = vector.shape_cast %1 : vector<1x256xf32> to vector<1x1x256xf32>
    %cst_2 = arith.constant 3.125000e-02 : f32
    %3 = vector.broadcast %cst_2 : f32 to vector<1x1x256xf32>
    %4 = arith.mulf %2, %3 : vector<1x1x256xf32>
    %5 = vector.broadcast %4 : vector<1x1x256xf32> to vector<1x32x256xf32>
    %6 = arith.subf %0, %5 : vector<1x32x256xf32>
    %7 = arith.mulf %6, %6 : vector<1x32x256xf32>
    %cst_3 = arith.constant dense<0.000000e+00> : vector<1x256xf32>
    %8 = vector.multi_reduction <add>, %7, %cst_3 [1] : vector<1x32x256xf32> to vector<1x256xf32>
    %9 = vector.shape_cast %8 : vector<1x256xf32> to vector<1x1x256xf32>
    %cst_4 = arith.constant 3.125000e-02 : f32
    %10 = vector.broadcast %cst_4 : f32 to vector<1x1x256xf32>
    %11 = arith.mulf %9, %10 : vector<1x1x256xf32>
    %cst_5 = arith.constant 9.99999974E-6 : f32
    %12 = vector.broadcast %cst_5 : f32 to vector<1x1x256xf32>
    %13 = arith.addf %11, %12 : vector<1x1x256xf32>
    %14 = math.rsqrt %13 : vector<1x1x256xf32>
    %15 = vector.broadcast %14 : vector<1x1x256xf32> to vector<1x32x256xf32>
    %16 = arith.mulf %6, %15 : vector<1x32x256xf32>
    %c0_6 = arith.constant 0 : index
    %c0_7 = arith.constant 0 : index
    %c0_8 = arith.constant 0 : index
    %17 = vector.load %arg3[%c0_6, %c0_7, %c0_8] : memref<1x32x1xf32, #tpu.memory_space<vmem>>, vector<1x32x1xf32>
    %18 = vector.broadcast %17 : vector<1x32x1xf32> to vector<1x32x256xf32>
    %19 = arith.mulf %16, %18 : vector<1x32x256xf32>
    %c0_9 = arith.constant 0 : index
    %c0_10 = arith.constant 0 : index
    %c0_11 = arith.constant 0 : index
    %20 = vector.load %arg4[%c0_9, %c0_10, %c0_11] : memref<1x32x1xf32, #tpu.memory_space<vmem>>, vector<1x32x1xf32>
    %21 = vector.broadcast %20 : vector<1x32x1xf32> to vector<1x32x256xf32>
    %22 = arith.addf %19, %21 : vector<1x32x256xf32>
    %c0_12 = arith.constant 0 : index
    %c0_13 = arith.constant 0 : index
    %c0_14 = arith.constant 0 : index
    %23 = vector.load %arg5[%c0_12, %c0_13, %c0_14] : memref<1x32x256xf32, #tpu.memory_space<vmem>>, vector<1x32x256xf32>
    tpu.vector_store %arg5[%c0_12, %c0_13, %c0_14], %22 {strides = array<i32>} : memref<1x32x256xf32, #tpu.memory_space<vmem>>, vector<1x32x256xf32>,
    return
  }
  func.func @transform_0(%arg0: i32, %arg1: i32) -> (i32, i32, i32) {
    %c0_i32 = arith.constant 0 : i32
    %c0_i32_0 = arith.constant 0 : i32
    return %arg0, %c0_i32, %arg1 : i32, i32, i32
  }
  func.func @transform_1(%arg0: i32, %arg1: i32) -> (i32, i32, i32) {
    %c0_i32 = arith.constant 0 : i32
    %c0_i32_0 = arith.constant 0 : i32
    %c0_i32_1 = arith.constant 0 : i32
    %c0_i32_2 = arith.constant 0 : i32
    return %c0_i32, %c0_i32_0, %c0_i32_1 : i32, i32, i32
  }
  func.func @transform_2(%arg0: i32, %arg1: i32) -> (i32, i32, i32) {
    %c0_i32 = arith.constant 0 : i32
    %c0_i32_0 = arith.constant 0 : i32
    %c0_i32_1 = arith.constant 0 : i32
    %c0_i32_2 = arith.constant 0 : i32
    return %c0_i32, %c0_i32_0, %c0_i32_1 : i32, i32, i32
  }
  func.func @transform_3(%arg0: i32, %arg1: i32) -> (i32, i32, i32) {
    %c0_i32 = arith.constant 0 : i32
    %c0_i32_0 = arith.constant 0 : i32
    return %arg0, %c0_i32, %arg1 : i32, i32, i32
  }
}

</mosaic_0001>

<bundles_post_ra>
// kernel: with_bias_layernorm_nchw.1
= control target key start
LH: loop header
LB: loop body
LE: loop exit
PB: predicated region body
PF: predicated region fallthrough
CT: control target
= control target key end

     0   :  { %s534_s12 = smov 0   ;;  %s536_s13 = smov 0   ;;  %s598_s0 = inlined_call_operand.vmem [shape: f32[2,32,256], index: 0, kind: input, shape index: {}]   ;;  %s599_s1 = inlined_call_operand.vmem [shape: f32[1,32,1], index: 1, kind: input, shape index: {}]   ;;  %s600_s2 = inlined_call_operand.vmem [shape: f32[1,32,1], index: 2, kind: input, shape index: {}]   ;;  %s601_s3 = inlined_call_operand.vmem [shape: f32[2,32,256], index: 3, kind: output, shape index: {}]  }
   0x1   :  { %s538_s14 = smov 0  }
   0x2 LB: > { %s25_s15 = sadd.s32 1, %s507_s13  ;;  %p449_p0 = scmp.ge.s32.totalorder %s511_s14, 1  ;;  %s511_s14 = sphi %s538_s14, %s13_s14   ;;  %s507_s13 = sphi %s536_s13, %s603_s13   ;;  %s503_s12 = sphi %s534_s12, %s602_s12  }
   0x3   : > { %p27_p1 = scmp.ge.s32.totalorder %s25_s15, 2  ;;  %p158_p2 = scmp.lt.s32.totalorder %s511_s14, 3 }
   0x5   : > { %s605_s15 = smov (%p27_p1, %s25_s15), 0  ;;  %p159_p3 = pnand %p449_p0, %p158_p2 }
   0x6   : > { %v288_v0 = vld [vmem:[%s599_s1 + $0x10] sm:$0xff] (!%p159_p3)  ;;  %v286_v1 = vld [vmem:[%s599_s1] sm:$0xff] (!%p159_p3)  ;;  %v513_v2 = vmov (!%p159_p3), 0   ;;  %v289_v3 = vld [vmem:[%s599_s1 + $0x18] sm:$0xff] (!%p159_p3)  ;;  %p191_p4 = scmp.lt.s32.totalorder (!%p159_p3), %s503_s12, 1 }
   0x7   : > { %162 = sbr.rel (%p159_p3) target bundleno = 152 (0x98), region = 32  ;;  %484 = vset.pattern.permute.xlu1 (!%p159_p3), %v513_v2  ;;  %483 = vset.pattern.permute.xlu0 (!%p159_p3), %v513_v2  ;;  %v287_v4 = vld [vmem:[%s599_s1 + $0x8] sm:$0xff] (!%p159_p3)  ;;  %v318_v6 = vld [vmem:[%s600_s2] sm:$0xff] (!%p159_p3)  ;;  %v321_v7 = vld [vmem:[%s600_s2 + $0x18] sm:$0xff] (!%p159_p3) }
   0x8   : > { %302 = vperm.xlu1 (!%p159_p3), %484, %v288_v0   ;;  %292 = vperm.xlu0 (!%p159_p3), %483, %v286_v1   ;;  %v319_v5 = vld [vmem:[%s600_s2 + $0x8] sm:$0xff] (!%p159_p3)  ;;  %v320_v8 = vld [vmem:[%s600_s2 + $0x10] sm:$0xff] (!%p159_p3) }
   0xc   : > { %307 = vperm.xlu1 (!%p159_p3), %484, %v289_v3   ;;  %297 = vperm.xlu0 (!%p159_p3), %483, %v287_v4  }
   0xe   : > { %s607_s12 = smov (!%p191_p4, %s503_s12), 1 }
   0xf   : > { %s456_s5 = sshll.u32 %s607_s12, 6 }
  0x10   : > { %329 = vperm.xlu1 %484, %v319_v5   ;;  %324 = vperm.xlu0 %483, %v318_v6   ;;  %s198_s8 = scalar_lea.vmem %s598_s0, %s456_s5  ;;  %s208_s11 = scalar_lea.vmem %s601_s3, %s456_s5 }
  0x11   : > { %v210_v9 = vld [vmem:[%s198_s8] sm:$0xff]  ;;  %v212_v10 = vld [vmem:[%s198_s8 + $0x10] sm:$0xff]  ;;  %v211_v11 = vld [vmem:[%s198_s8 + $0x8] sm:$0xff] }
  0x12   : > { %v213_v12 = vld [vmem:[%s198_s8 + $0x18] sm:$0xff]  ;;  %v218_v13 = vadd.f32 %v212_v10, %v210_v9  ;;  %v214_v14 = vld [vmem:[%s198_s8 + $0x20] sm:$0xff]  ;;  %v215_v16 = vld [vmem:[%s198_s8 + $0x28] sm:$0xff] }
  0x13   : > { %v227_v15 = vadd.f32 %v213_v12, %v211_v11  ;;  %v216_v18 = vld [vmem:[%s198_s8 + $0x30] sm:$0xff]  ;;  %v217_v20 = vld [vmem:[%s198_s8 + $0x38] sm:$0xff] }
  0x14   : > { %339 = vperm.xlu1 %484, %v321_v7   ;;  %334 = vperm.xlu0 %483, %v320_v8   ;;  %v219_v17 = vadd.f32 %v218_v13, %v214_v14 }
  0x15   : > { %v228_v19 = vadd.f32 %v227_v15, %v215_v16 }
  0x16   : > { %v220_v21 = vadd.f32 %v219_v17, %v216_v18 }
  0x17   : > { %v229_v22 = vadd.f32 %v228_v19, %v217_v20 }
  0x18   : > { %v221_v23 = vrot.slane %v220_v21, 4 }
  0x19   : > { %v230_v24 = vrot.slane %v229_v22, 4 }
  0x1a   : > { %v222_v25 = vadd.f32 %v221_v23, %v220_v21 }
  0x1b   : > { %v231_v26 = vadd.f32 %v230_v24, %v229_v22 }
  0x1c   : > { %v223_v27 = vrot.slane %v222_v25, 2 }
  0x1d   : > { %v232_v28 = vrot.slane %v231_v26, 2 }
  0x1e   : > { %v224_v29 = vadd.f32 %v223_v27, %v222_v25 }
  0x1f   : > { %v233_v30 = vadd.f32 %v232_v28, %v231_v26 }
  0x20   : > { %v225_v31 = vrot.slane %v224_v29, 1 }
  0x21   : > { %v234_v32 = vrot.slane %v233_v30, 1 }
  0x22   : > { %v226_v33 = vadd.f32 %v225_v31, %v224_v29 }
  0x23   : > { %v235_v34 = vadd.f32 %v234_v32, %v233_v30 }
  0x24   : > { %v236_v35 = vmul.f32 0.03125, %v226_v33 }
  0x25   : > { %v237_v36 = vmul.f32 0.03125, %v235_v34 }
  0x26   : > { %v238_v37 = vsub.f32 %v210_v9, %v236_v35  ;;  %v240_v38 = vsub.f32 %v212_v10, %v236_v35  ;;  %v242_v41 = vsub.f32 %v214_v14, %v236_v35  ;;  %v244_v47 = vsub.f32 %v216_v18, %v236_v35 }
  0x27   : > { %v239_v39 = vsub.f32 %v211_v11, %v237_v36  ;;  %v241_v40 = vsub.f32 %v213_v12, %v237_v36  ;;  %v243_v44 = vsub.f32 %v215_v16, %v237_v36  ;;  %v245_v50 = vsub.f32 %v217_v20, %v237_v36 }
  0x28   : > { %v246_v42 = vmul.f32 %v238_v37, %v238_v37  ;;  %v248_v43 = vmul.f32 %v240_v38, %v240_v38  ;;  %v250_v48 = vmul.f32 %v242_v41, %v242_v41  ;;  %v252_v53 = vmul.f32 %v244_v47, %v244_v47 }
  0x29   : > { %v247_v45 = vmul.f32 %v239_v39, %v239_v39  ;;  %v249_v46 = vmul.f32 %v241_v40, %v241_v40  ;;  %v251_v51 = vmul.f32 %v243_v44, %v243_v44  ;;  %v253_v55 = vmul.f32 %v245_v50, %v245_v50 }
  0x2a   : > { %v254_v49 = vadd.f32 %v248_v43, %v246_v42 }
  0x2b   : > { %v263_v52 = vadd.f32 %v249_v46, %v247_v45 }
  0x2c   : > { %v255_v54 = vadd.f32 %v254_v49, %v250_v48 }
  0x2d   : > { %v264_v56 = vadd.f32 %v263_v52, %v251_v51 }
  0x2e   : > { %v256_v57 = vadd.f32 %v255_v54, %v252_v53 }
  0x2f   : > { %v265_v58 = vadd.f32 %v264_v56, %v253_v55 }
  0x30   : > { %v257_v59 = vrot.slane %v256_v57, 4 }
  0x31   : > { %v266_v60 = vrot.slane %v265_v58, 4 }
  0x32   : > { %v258_v61 = vadd.f32 %v257_v59, %v256_v57 }
  0x33   : > { %v267_v62 = vadd.f32 %v266_v60, %v265_v58 }
  0x34   : > { %v259_v63 = vrot.slane %v258_v61, 2 }
  0x35   : > { %v268_v0 = vrot.slane %v267_v62, 2 }
  0x36   : > { %v260_v1 = vadd.f32 %v259_v63, %v258_v61 }
  0x37   : > { %v269_v2 = vadd.f32 %v268_v0, %v267_v62 }
  0x38   : > { %v261_v3 = vrot.slane %v260_v1, 1 }
  0x39   : > { %v270_v4 = vrot.slane %v269_v2, 1 }
  0x3a   : > { %v262_v5 = vadd.f32 %v261_v3, %v260_v1 }
  0x3b   : > { %v271_v6 = vadd.f32 %v270_v4, %v269_v2 }
  0x3c   : > { %v272_v7 = vmul.f32 0.03125, %v262_v5 }
  0x3d   : > { %v273_v8 = vmul.f32 0.03125, %v271_v6 }
  0x3e   : > { %v274_v9 = vadd.f32 1e-05, %v272_v7 }
  0x3f   : > { %v275_v10 = vadd.f32 1e-05, %v273_v8 }
  0x40   : > { %485 = vrsqrt.f32 %v274_v9 }
  0x41   : > { %487 = vrsqrt.f32 %v275_v10 }
  0x4a   : > { %v486_v11 = vpop.eup %485 }
  0x4b   : > { %v488_v12 = vpop.eup %487  ;;  %v278_v15 = vmul.f32 %v486_v11, %v238_v37  ;;  %v280_v17 = vmul.f32 %v486_v11, %v240_v38  ;;  %v282_v21 = vmul.f32 %v486_v11, %v242_v41  ;;  %v284_v23 = vmul.f32 %v486_v11, %v244_v47 }
  0x4c   : > { %v279_v16 = vmul.f32 %v488_v12, %v239_v39  ;;  %v281_v18 = vmul.f32 %v488_v12, %v241_v40  ;;  %v283_v22 = vmul.f32 %v488_v12, %v243_v44  ;;  %v285_v24 = vmul.f32 %v488_v12, %v245_v50 }
  0x87   : > { %v303_v13 = vpop.permute.xlu1 %302  ;;  %v293_v14 = vpop.permute.xlu0 %292 }
  0x88   : > { %v310_v25 = vmul.f32 %v293_v14, %v278_v15  ;;  %v311_v26 = vmul.f32 %v293_v14, %v279_v16  ;;  %v314_v35 = vmul.f32 %v303_v13, %v282_v21  ;;  %v315_v36 = vmul.f32 %v303_v13, %v283_v22 }
  0x8b   : > { %v308_v19 = vpop.permute.xlu1 %307  ;;  %v298_v20 = vpop.permute.xlu0 %297 }
  0x8c   : > { %v312_v27 = vmul.f32 %v298_v20, %v280_v17  ;;  %v313_v28 = vmul.f32 %v298_v20, %v281_v18  ;;  %v316_v37 = vmul.f32 %v308_v19, %v284_v23  ;;  %v317_v38 = vmul.f32 %v308_v19, %v285_v24 }
  0x8f   : > { %v330_v29 = vpop.permute.xlu1 %329  ;;  %v325_v30 = vpop.permute.xlu0 %324 }
  0x90   : > { %v344_v31 = vadd.f32 %v330_v29, %v312_v27  ;;  %v345_v32 = vadd.f32 %v330_v29, %v313_v28  ;;  %v342_v33 = vadd.f32 %v325_v30, %v310_v25  ;;  %v343_v34 = vadd.f32 %v325_v30, %v311_v26 }
  0x92   : > { %352 = vst [vmem:[%s208_s11 + $0x10] sm:$0xff] %v344_v31  ;;  %353 = vst [vmem:[%s208_s11 + $0x18] sm:$0xff] %v345_v32 }
  0x93   : > { %350 = vst [vmem:[%s208_s11] sm:$0xff] %v342_v33  ;;  %351 = vst [vmem:[%s208_s11 + $0x8] sm:$0xff] %v343_v34  ;;  %v340_v39 = vpop.permute.xlu1 %339  ;;  %v335_v40 = vpop.permute.xlu0 %334 }
  0x94   : > { %v348_v41 = vadd.f32 %v340_v39, %v316_v37  ;;  %v349_v42 = vadd.f32 %v340_v39, %v317_v38  ;;  %v346_v43 = vadd.f32 %v335_v40, %v314_v35  ;;  %v347_v44 = vadd.f32 %v335_v40, %v315_v36 }
  0x96   : > { %356 = vst [vmem:[%s208_s11 + $0x30] sm:$0xff] %v348_v41  ;;  %357 = vst [vmem:[%s208_s11 + $0x38] sm:$0xff] %v349_v42 }
  0x97   : > { %354 = vst [vmem:[%s208_s11 + $0x20] sm:$0xff] %v346_v43  ;;  %355 = vst [vmem:[%s208_s11 + $0x28] sm:$0xff] %v347_v44 }
  0x98 PF: > { %s13_s14 = sadd.s32 1, %s511_s14   ;;  %s602_s12 = smov %s507_s13 }
  0x99   : > { %p10_p5 = scmp.ge.s32.totalorder %s13_s14, 4   ;;  %s603_s13 = smov %s605_s15 }
  0x9b   :  { %12 = sbr.rel (!%p10_p5) target bundleno = 2 (0x2), region = 62 }

</bundles_post_ra>
